<compile_context>
chip_gen: v7x
topology: tpu7x:2x2x1
jax: 0.10.0
libtpu: 0.0.40
codegen_flags: <defaults>
</compile_context>

<pallas_src>
import functools

import jax
import jax.numpy as jnp
from jax import lax
from jax.experimental import pallas as pl
from jax.experimental.pallas import tpu as pltpu


def _round_up(x: int, m: int) -> int:
    return ((x + m - 1) // m) * m


def ae_loss_kernel(x_ref, m_ref, b_ref, out_ref, *, chunk, acc_rows):
    """Sum of squared reconstruction errors, partial-summed per core.

    x_ref   : (TN, D)  bf16  pre-masked embeddings (pad rows are exact zeros)
    m_ref   : (D, D)   bf16  I - W^T (identity folded into the decoder weight)
    b_ref   : (1, D)   f32   decoder bias
    out_ref : (1, K, D) f32  per-core partial-sum accumulator (resident block)
    """
    i = pl.program_id(1)

    @pl.when(i == 0)
    def _init():
        out_ref[...] = jnp.zeros_like(out_ref)

    m = m_ref[...]                      # resident, hoisted out of the loop
    b = b_ref[...]
    tn, d = x_ref.shape
    n_chunks = tn // chunk

    def body(c, acc):
        r0 = pl.multiple_of(c * chunk, chunk)
        xc = x_ref[pl.ds(r0, chunk), :]                       # (chunk, D) bf16
        # diff = x - (x @ W^T + b) == x @ (I - W^T) - b
        diff = jnp.dot(xc, m, preferred_element_type=jnp.float32) - b
        sq = diff * diff                                      # (chunk, D) f32
        return acc + jnp.sum(sq.reshape(chunk // acc_rows, acc_rows, d), axis=0)

    acc0 = jnp.zeros((acc_rows, d), jnp.float32)
    acc = lax.fori_loop(0, n_chunks, body, acc0, unroll=min(n_chunks, 8))
    out_ref[...] += acc[None, :, :]


def autoencoder_pretraining_loss(tokens, emb_table, dec_w, dec_b, *, tile_n=8192):
    """Embedding lookup (XLA glue) + Pallas masked-MSE kernel."""
    B, S = tokens.shape
    D = emb_table.shape[1]
    N = B * S

    P = 2        # outer parallel grid axis: feeds both TensorCores on v7x,
                 # degenerates to a cheap serial outer loop on 1-TC v5e/v6e.
    CHUNK = 1024 # in-kernel compute sub-block (bounds f32 temporaries)
    K = 32       # accumulator rows -> 4 independent vreg accumulation streams

    flat = tokens.reshape(-1).astype(jnp.int32)

    # Tile size: multiple of CHUNK, capped near the per-core share of rows.
    tn = max(CHUNK, min(_round_up(tile_n, CHUNK), _round_up(pl.cdiv(N, P), CHUNK)))
    n_pad = _round_up(N, P * tn)
    inner = n_pad // (P * tn)

    flat_p = jnp.pad(flat, (0, n_pad - N))          # pad id 0
    nonpad = (flat_p != 0)

    # Gather (XLA), zero the pad rows exactly, ship activations as bf16
    # (halves HBM bytes of the dominant stream).
    # TODO(synk): fuse this gather into the kernel (manual DMA row gather or a
    #             resident bf16 table) to drop the remaining HBM round-trip.
    x = emb_table[flat_p].astype(jnp.float32) * nonpad[:, None].astype(jnp.float32)
    x = x.astype(jnp.bfloat16)

    # Fold the identity into the decoder weight: diff = x @ (I - W^T) - b.
    m = (jnp.eye(D, dtype=jnp.float32)
         - dec_w.astype(jnp.float32).T).astype(jnp.bfloat16)
    b2d = dec_b.reshape(1, D).astype(jnp.float32)

    kern = functools.partial(ae_loss_kernel, chunk=CHUNK, acc_rows=K)

    partials = pl.pallas_call(
        kern,
        out_shape=jax.ShapeDtypeStruct((P, K, D), jnp.float32),
        grid_spec=pltpu.PrefetchScalarGridSpec(
            num_scalar_prefetch=0,
            grid=(P, inner),
            in_specs=[
                pl.BlockSpec((tn, D), lambda p, i: (p * inner + i, 0)),  # x tile
                pl.BlockSpec((D, D), lambda p, i: (0, 0)),   # I - W^T (resident)
                pl.BlockSpec((1, D), lambda p, i: (0, 0)),   # bias (resident)
            ],
            out_specs=pl.BlockSpec((1, K, D), lambda p, i: (p, 0, 0)),
        ),
        compiler_params=pltpu.CompilerParams(
            dimension_semantics=("parallel", "arbitrary"),
            vmem_limit_bytes=32 * 1024 * 1024,
        ),
    )(x, m, b2d)                                     # (P, K, D) f32 partials

    # Every zeroed (pad) row contributes exactly ||b||^2; remove analytically.
    count = jnp.sum(nonpad.astype(jnp.float32))
    pad_rows = jnp.float32(n_pad) - count
    sq_sum = jnp.sum(partials) - pad_rows * jnp.sum(b2d * b2d)

    # Mean over selected elements.  NOTE: PyTorch would return NaN (0/0) for an
    # all-pad batch; we guard the denominator instead (intentional divergence).
    denom = jnp.maximum(count * jnp.float32(D), 1.0)
    return sq_sum / denom


def reference_loss(tokens, emb_table, dec_w, dec_b):
    """Pure-JAX (f32) reference mirroring the PyTorch forward."""
    D = emb_table.shape[1]
    flat = tokens.reshape(-1)
    x = emb_table[flat].astype(jnp.float32)
    mask = (flat != 0).astype(jnp.float32)[:, None]
    y = x @ dec_w.T + dec_b[None, :]
    sq = (x - y) ** 2 * mask
    return jnp.sum(sq) / (jnp.sum(mask) * D)


if __name__ == "__main__":
    key = jax.random.PRNGKey(0)
    k_emb, k_w, k_b, k_tok = jax.random.split(key, 4)

    # Small deterministic shapes consistent with the module:
    #   batch=2, max_seq_length=8, embedding_dim=128, vocab=32
    B, S, D, V = 2, 8, 128, 32

    emb_table = jax.random.normal(k_emb, (V, D), dtype=jnp.float32)
    # nn.Linear(D, D)-style params (deterministic synthetic values)
    dec_w = jax.random.uniform(k_w, (D, D), dtype=jnp.float32,
                               minval=-1.0 / jnp.sqrt(D), maxval=1.0 / jnp.sqrt(D))
    dec_b = jax.random.uniform(k_b, (D,), dtype=jnp.float32,
                               minval=-1.0 / jnp.sqrt(D), maxval=1.0 / jnp.sqrt(D))

    # token ids with some explicit pads (id 0)
    tokens = jax.random.randint(k_tok, (B, S), 1, V, dtype=jnp.int32)
    tokens = tokens.at[0, 5:].set(0)   # pad tail of first sequence
    tokens = tokens.at[1, 7].set(0)    # pad last token of second sequence

    loss = autoencoder_pretraining_loss(tokens, emb_table, dec_w, dec_b)
    loss = jax.block_until_ready(loss)

    ref = reference_loss(tokens, emb_table, dec_w, dec_b)
    # Kernel ships x and (I - W^T) in bf16 (MXU-native, memory-bound win);
    # allow bf16-level slack vs the f32 reference.
    assert jnp.allclose(loss, ref, rtol=5e-3, atol=5e-3), (loss, ref)

    print("KERNEL_OK")
</pallas_src>

<mosaic_0001>
module attributes {stable_mosaic.version = 11 : i64} {
  func.func @ae_loss_kernel(%arg0: i32, %arg1: i32, %arg2: memref<1024x128xbf16, #tpu.memory_space<vmem>>, %arg3: memref<128x128xbf16, #tpu.memory_space<vmem>>, %arg4: memref<1x128xf32, #tpu.memory_space<vmem>>, %arg5: memref<1x32x128xf32, #tpu.memory_space<vmem>>) attributes {dimension_semantics = [#tpu.dimension_semantics<parallel>, #tpu.dimension_semantics<arbitrary>], iteration_bounds = array<i64: 2, 1>, scalar_prefetch = 0 : i64, scratch_operands = 0 : i64, tpu.core_type = #tpu.core_type<tc>, window_params = [{transform_indices = @transform_0, window_bounds = array<i64: 1024, 128>}, {pipeline_mode = #tpu.pipeline_mode<synchronous>, transform_indices = @transform_1, window_bounds = array<i64: 128, 128>}, {pipeline_mode = #tpu.pipeline_mode<synchronous>, transform_indices = @transform_2, window_bounds = array<i64: 1, 128>}, {transform_indices = @transform_3, window_bounds = array<i64: 1, 32, 128>}]} {
    %c0_i32 = arith.constant 0 : i32
    %0 = arith.cmpi eq, %arg1, %c0_i32 : i32
    %1 = arith.extui %0 : i1 to i32
    %c0_i32_0 = arith.constant 0 : i32
    %2 = arith.cmpi ne, %1, %c0_i32_0 : i32
    scf.if %2 {
      %cst_14 = arith.constant 0.000000e+00 : f32
      %21 = vector.broadcast %cst_14 : f32 to vector<1x32x128xf32>
      %c0_15 = arith.constant 0 : index
      %c0_16 = arith.constant 0 : index
      %c0_17 = arith.constant 0 : index
      %22 = vector.load %arg5[%c0_15, %c0_16, %c0_17] : memref<1x32x128xf32, #tpu.memory_space<vmem>>, vector<1x32x128xf32>
      tpu.vector_store %arg5[%c0_15, %c0_16, %c0_17], %21 {strides = array<i32>} : memref<1x32x128xf32, #tpu.memory_space<vmem>>, vector<1x32x128xf32>,
    } else {
    }
    %c0 = arith.constant 0 : index
    %c0_1 = arith.constant 0 : index
    %3 = vector.load %arg3[%c0, %c0_1] : memref<128x128xbf16, #tpu.memory_space<vmem>>, vector<128x128xbf16>
    %c0_2 = arith.constant 0 : index
    %c0_3 = arith.constant 0 : index
    %4 = vector.load %arg4[%c0_2, %c0_3] : memref<1x128xf32, #tpu.memory_space<vmem>>, vector<1x128xf32>
    %cst = arith.constant 0.000000e+00 : f32
    %5 = vector.broadcast %cst : f32 to vector<32x128xf32>
    %c0_i32_4 = arith.constant 0 : i32
    %c1024_i32 = arith.constant 1024 : i32
    %6 = arith.muli %c0_i32_4, %c1024_i32 : i32
    %7 = tpu.assume_multiple %6, 1024 : i32
    %8 = arith.index_cast %7 : i32 to index
    %c0_5 = arith.constant 0 : index
    %9 = vector.load %arg2[%8, %c0_5] : memref<1024x128xbf16, #tpu.memory_space<vmem>>, vector<1024x128xbf16>
    %cst_6 = arith.constant dense<0.000000e+00> : vector<1024x128xf32>
    %10 = tpu.matmul %9, %3, %cst_6 {dimension_numbers = #tpu.dot_dimension_numbers<[1], [0], [0], [1], [0, 0, 1, 1], [], []>} : vector<1024x128xbf16>, vector<128x128xbf16>, vector<1024x128xf32> -> vector<1024x128xf32>
    %11 = vector.broadcast %4 : vector<1x128xf32> to vector<1024x128xf32>
    %12 = arith.subf %10, %11 : vector<1024x128xf32>
    %13 = arith.mulf %12, %12 : vector<1024x128xf32>
    %14 = vector.shape_cast %13 : vector<1024x128xf32> to vector<32x32x128xf32>
    %cst_7 = arith.constant dense<0.000000e+00> : vector<32x128xf32>
    %15 = vector.multi_reduction <add>, %14, %cst_7 [0] : vector<32x32x128xf32> to vector<32x128xf32>
    %16 = arith.addf %5, %15 : vector<32x128xf32>
    %c1_i32 = arith.constant 1 : i32
    %c0_8 = arith.constant 0 : index
    %c0_9 = arith.constant 0 : index
    %c0_10 = arith.constant 0 : index
    %17 = vector.load %arg5[%c0_8, %c0_9, %c0_10] : memref<1x32x128xf32, #tpu.memory_space<vmem>>, vector<1x32x128xf32>
    %18 = vector.shape_cast %16 : vector<32x128xf32> to vector<1x32x128xf32>
    %19 = arith.addf %17, %18 : vector<1x32x128xf32>
    %c0_11 = arith.constant 0 : index
    %c0_12 = arith.constant 0 : index
    %c0_13 = arith.constant 0 : index
    %20 = vector.load %arg5[%c0_11, %c0_12, %c0_13] : memref<1x32x128xf32, #tpu.memory_space<vmem>>, vector<1x32x128xf32>
    tpu.vector_store %arg5[%c0_11, %c0_12, %c0_13], %19 {strides = array<i32>} : memref<1x32x128xf32, #tpu.memory_space<vmem>>, vector<1x32x128xf32>,
    return
  }
  func.func @transform_0(%arg0: i32, %arg1: i32) -> (i32, i32) {
    %c1_i32 = arith.constant 1 : i32
    %0 = arith.muli %arg0, %c1_i32 : i32
    %1 = arith.addi %0, %arg1 : i32
    %c0_i32 = arith.constant 0 : i32
    %c0_i32_0 = arith.constant 0 : i32
    return %1, %c0_i32 : i32, i32
  }
  func.func @transform_1(%arg0: i32, %arg1: i32) -> (i32, i32) {
    %c0_i32 = arith.constant 0 : i32
    %c0_i32_0 = arith.constant 0 : i32
    %c0_i32_1 = arith.constant 0 : i32
    return %c0_i32, %c0_i32_0 : i32, i32
  }
  func.func @transform_2(%arg0: i32, %arg1: i32) -> (i32, i32) {
    %c0_i32 = arith.constant 0 : i32
    %c0_i32_0 = arith.constant 0 : i32
    %c0_i32_1 = arith.constant 0 : i32
    return %c0_i32, %c0_i32_0 : i32, i32
  }
  func.func @transform_3(%arg0: i32, %arg1: i32) -> (i32, i32, i32) {
    %c0_i32 = arith.constant 0 : i32
    %c0_i32_0 = arith.constant 0 : i32
    %c0_i32_1 = arith.constant 0 : i32
    return %arg0, %c0_i32, %c0_i32_0 : i32, i32, i32
  }
}

</mosaic_0001>

<bundles_post_ra>
// kernel: tpu_custom_call.1
= control target key start
LH: loop header
LB: loop body
LE: loop exit
PB: predicated region body
PF: predicated region fallthrough
CT: control target
= control target key end

     0   :  { %8 = vsyncpa [#allocation3], 0  ;;  %s3232_s0 = inlined_call_operand.hbm [shape: bf16[2048,128], index: 0, kind: input, shape index: {}]   ;;  %s3233_s1 = inlined_call_operand.hbm [shape: bf16[128,128], index: 1, kind: input, shape index: {}]   ;;  %s3234_s2 = inlined_call_operand.vmem [shape: f32[1,128], index: 2, kind: input, shape index: {}]   ;;  %s3235_s3 = inlined_call_operand.hbm [shape: f32[2,32,128], index: 3, kind: output, shape index: {}]  }
   0x1   :  { %10 = vsyncpa [#allocation3 + $0x1], 0 }
   0x2   :  { %11 = vsyncpa [#allocation6], 0 }
   0x3   :  { %12 = vsyncpa [#allocation4], 0 }
   0x4   :  { %14 = vsyncpa [#allocation4 + $0x1], 0  ;;  %s2507_s12 = smov 0   ;;  %s2509_s13 = smov 0  }
   0x5   :  { %s2511_s14 = smov 0   ;;  %s2513_s15 = smov 0  }
   0x6   :  { %s2515_s16 = smov 0   ;;  %s2517_s17 = smov 0  }
   0x7 LB: > { %s1860_s18 = sadd.s32 4294967295, %s2478_s17   ;;  %s1861_s19 = sadd.s32 4294967294, %s2478_s17   ;;  %s2478_s17 = sphi %s2517_s17, %s20_s17   ;;  %s2474_s16 = sphi %s2515_s16, %s3301_s16   ;;  %s2470_s15 = sphi %s2513_s15, %s3300_s15   ;;  %s2466_s14 = sphi %s2511_s14, %s3299_s14   ;;  %s2462_s13 = sphi %s2509_s13, %s3298_s13   ;;  %s2458_s12 = sphi %s2507_s12, %s3297_s12  }
   0x8   : > { %p54_p0 = scmp.ne.s32.totalorder %s2462_s13, %s2458_s12  ;;  %p2541_p1 = scmp.eq.s32.totalorder %s1860_s18, 0 }
   0x9   : > { %p2545_p2 = scmp.eq.s32.totalorder %s1860_s18, 1  ;;  %p126_p3 = scmp.eq.s32.totalorder %s1861_s19, 1 }
   0xa   : > { %s3240_s20 = scalar_select %p2541_p1, 1, 0 }
   0xb   : > { %s3241_s21 = scalar_select %p2545_p2, 1, 0 }
   0xc   : > { %p2551_p4 = por %p2541_p1, %p54_p0  ;;  %p1862_p5 = scmp.ge.s32.totalorder %s2478_s17, 1 }
   0xd   : > { %p2556_p6 = por %p126_p3, %p54_p0  ;;  %p133_p7 = scmp.lt.s32.totalorder %s2478_s17, 3 }
   0xe   : > { %s3242_s22 = scalar_select %p2551_p4, 1, 0 }
   0xf   : > { %s3243_s23 = scalar_select %p2556_p6, 1, 0 }
  0x10   : > { %p2561_p8 = pnand %p1862_p5, %p133_p7  ;;  %s2480_s25 = smov [#allocation5]  }
  0x11   : > { %s145_s26 = sshll.u32 %s2480_s25, 4  ;;  %s32_s28 = sadd.s32 1, %s2474_s16  ;;  %s146_s26 = int_to_ptr.vmem [resolvable:$true] %s145_s26 }
  0x12   : > { %s3244_s24 = scalar_select %p2561_p8, 1, 0 }
  0x13   : > { %p2192_p9 = pneg %p2561_p8  ;;  %s2334_s4 = scalar_lea.hbm %s3233_s1, 1024 }
  0x14   : > { %p2335_p12 = scmp.ne.s32.totalorder %s3233_s1, %s2334_s4  ;;  %p2341_p5 = scmp.lt.u32.totalorder %s2334_s4, %s3233_s1 }
  0x15   : > { %p2570_p11 = pnand %p2192_p9, %p2541_p1 }
  0x17   : > { %p2336_p13 = pneg %p2570_p11 }
  0x19   : > { %p2337_p0 = pnand %p2336_p13, %p2335_p12 }
  0x1b   : > { %p2338_p3 = pneg %p2337_p0 }
  0x1d   : > { %p2343_p7 = pnand %p2341_p5, %p2338_p3 }
  0x1f   : > { %2346 = shalt.err (!%p2343_p7)
}
  0x20   : > { %s2347_s9 = scalar_lea.vmem %s146_s26, 1024  ;;  %p2355_p1 = scmp.lt.s32.totalorder %s146_s26, %s146_s26 }
  0x21   : > { %p2348_p9 = scmp.ne.s32.totalorder %s146_s26, %s2347_s9  ;;  %p2356_p4 = scmp.lt.s32.totalorder %s2347_s9, %s2347_s9 }
  0x23   : > { %p2350_p10 = pnand %p2348_p9, %p2336_p13  ;;  %p2357_p8 = por %p2356_p4, %p2355_p1 }
  0x25   : > { %p2351_p6 = pneg %p2350_p10 }
  0x27   : > { %p2358_p2 = pnand %p2357_p8, %p2351_p6 }
  0x29   : > { %2361 = shalt.err (!%p2358_p2)
}
  0x2a   : > { %s2481_s10 = smov 64   ;;  %s2482_s11 = smov 4  }
  0x2b   : > { %2195 = dma.hbm_to_vmem [thread:$0]  (!%p2570_p11), %s3233_s1, 1024, %s146_s26, [#allocation6], %s2481_s10, %s2481_s10, %s2482_s11  }
  0x2c   : > { %p34_p1 = scmp.ge.s32.totalorder %s32_s28, 2  ;;  %s41_s25 = sadd.s32 1, %s2466_s14 }
  0x2d   : > { %p48_p2 = scmp.ne.s32.totalorder %s2466_s14, %s2462_s13  ;;  %p49_p4 = scmp.eq.s32.totalorder %s2478_s17, 0 }
  0x2e   : > { %s3303_s28 = smov (%p34_p1, %s32_s28), 0  ;;  %p3247_p8 = scmp.ne.s32.totalorder %s3241_s21, 0 }
  0x2f   : > { %p2600_p6 = por %p49_p4, %p48_p2  ;;  %s38_s30 = ssub.s32 %s2474_s16, %s3303_s28 }
  0x30   : > { %p2606_p10 = por %p3247_p8, %p48_p2  ;;  %p2205_p12 = scmp.lt.s32.totalorder %s2478_s17, 2 }
  0x31   : > { %p39_p11 = scmp.eq.s32.totalorder %s38_s30, 0  ;;  %s162_s26 = sand.u32 1, %s2466_s14  }
  0x32   : > { %s1865_s4 = sshll.u32 %s162_s26, 9  ;;  %s1950_s6 = sshll.u32 %s2474_s16, 13 }
  0x33   : > { %s2615_s5 = scalar_select %p39_p11, %s2466_s14, %s41_s25  }
  0x34   : > { %s2621_s9 = scalar_lea.hbm %s3232_s0, %s1950_s6  ;;  %s166_s21 = scalar_lea.vmem [#allocation2], %s1865_s4 }
  0x35   : > { %s174_s18 = sshll.u32 %s166_s21, 4  ;;  %p2627_p13 = pnand %p2205_p12, %p2600_p6  ;;  %s2623_s18 = int_to_ptr.vmem [resolvable:$true] %s174_s18 }
  0x36   : > { %s2631_s25 = scalar_lea.sflag [#allocation3], %s162_s26  ;;  %s2362_s30 = scalar_lea.hbm %s2621_s9, 8192 }
  0x37   : > { %p2363_p0 = scmp.ne.s32.totalorder %s2621_s9, %s2362_s30  ;;  %p2364_p3 = pneg %p2627_p13 }
  0x38   : > { %s2367_s29 = scalar_lea.hbm %s3232_s0, 16384  ;;  %p2368_p9 = scmp.lt.u32.totalorder %s2621_s9, %s3232_s0 }
  0x39   : > { %p2365_p5 = pnand %p2364_p3, %p2363_p0  ;;  %p2369_p1 = scmp.lt.u32.totalorder %s2367_s29, %s2362_s30 }
  0x3a   : > { %p2371_p4 = scmp.lt.u32.totalorder %s2362_s30, %s2621_s9 }
  0x3b   : > { %p2366_p7 = pneg %p2365_p5  ;;  %p2370_p2 = por %p2369_p1, %p2368_p9 }
  0x3d   : > { %p2372_p6 = por %p2371_p4, %p2370_p2 }
  0x3f   : > { %p2373_p8 = pnand %p2372_p6, %p2366_p7 }
  0x41   : > { %2376 = shalt.err (!%p2373_p8)
}
  0x42   : > { %s2377_s26 = scalar_lea.vmem %s2623_s18, 8192  ;;  %s2483_s21 = smov [#allocation2]  }
  0x43   : > { %p2378_p12 = scmp.ne.s32.totalorder %s2623_s18, %s2377_s26  ;;  %s2382_s4 = sshll.u32 %s2483_s21, 4  ;;  %s2383_s4 = int_to_ptr.vmem [resolvable:$false] %s2382_s4 }
  0x44   : > { %s2384_s6 = scalar_lea.vmem %s2383_s4, 16384  ;;  %p2385_p5 = scmp.lt.s32.totalorder %s2623_s18, %s2383_s4 }
  0x45   : > { %p2380_p11 = pnand %p2378_p12, %p2364_p3  ;;  %p2386_p9 = scmp.lt.s32.totalorder %s2384_s6, %s2377_s26 }
  0x47   : > { %p2381_p0 = pneg %p2380_p11  ;;  %p2387_p1 = por %p2386_p9, %p2385_p5 }
  0x49   : > { %p2388_p2 = pnand %p2387_p1, %p2381_p0 }
  0x4b   : > { %2391 = shalt.err (!%p2388_p2)
}
  0x4c   : > { %2199 = dma.hbm_to_vmem [thread:$0]  (!%p2627_p13), %s2621_s9, 8192, %s2623_s18, %s2631_s25, %s2481_s10, %s2481_s10, %s2482_s11  }
  0x4d   : > { %p3250_p3 = scmp.ne.s32.totalorder %s3244_s24, 0 }
  0x4f   : > { %186 = sbr.rel (%p3250_p3) target bundleno = 514 (0x202), region = 32 }
  0x56   : > { %s2665_s30 = sand.u32 1, %s2462_s13   ;;  %p3251_p7 = scmp.ne.s32.totalorder %s3242_s22, 0 }
  0x57   : > { %s1869_s29 = sshll.u32 %s2665_s30, 9  ;;  %s189_s7 = scalar_lea.sflag [#allocation3], %s2665_s30 }
  0x58   : > { %s2669_s8 = scalar_lea.vmem [#allocation2], %s1869_s29 }
  0x59   : > { %2445 = dma.done.wait (%p3251_p7), %s189_s7, 8192  }
  0x5a   : > { %2447 = vsyncadd (%p3251_p7), %s189_s7, 4294959104  ;;  %p3252_p13 = scmp.ne.s32.totalorder %s3240_s20, 0 }
  0x5c   : > { %2449 = dma.done.wait (%p3252_p13), [#allocation6], 1024  }
  0x5d   : > { %2451 = vsyncadd (%p3252_p13), [#allocation6], 4294966272  ;;  %v2262_v0 = vld [vmem:[#allocation5] sm:$0xff]   ;;  %v2263_v1 = vld [vmem:[#allocation5 + $0x8] sm:$0xff]   ;;  %s1871_s24 = sshll.u32 %s2665_s30, 5  ;;  %s1951_s10 = sshll.u32 %s2470_s15, 9 }
  0x5e   : > { %2024 = vmatprep.subr.bf16.mxu0 %v2262_v0  ;;  %2168 = vmatprep.subr.bf16.mxu1 %v2262_v0  ;;  %v2264_v2 = vld [vmem:[#allocation5 + $0x10] sm:$0xff]   ;;  %v2265_v3 = vld [vmem:[#allocation5 + $0x18] sm:$0xff]   ;;  %v2270_v4 = vld [vmem:[%s2669_s8] sm:$0xff]   ;;  %s218_s11 = scalar_lea.vmem [#allocation7], %s1871_s24  ;;  %s3181_s25 = scalar_lea.hbm %s3235_s3, %s1951_s10 }
  0x5f   : > { %2025 = vmatpush3.bf16.msra.mxu0 %v2262_v0  ;;  %2176 = vmatpush3.bf16.msra.mxu1 %v2262_v0  ;;  %v2266_v5 = vld [vmem:[#allocation5 + $0x20] sm:$0xff]   ;;  %v2267_v6 = vld [vmem:[#allocation5 + $0x28] sm:$0xff]   ;;  %v2268_v8 = vld [vmem:[#allocation5 + $0x30] sm:$0xff]   ;;  %s1768_s9 = sshll.u32 %s218_s11, 4  ;;  %s1755_s26 = scalar_lea.sflag [#allocation4], %s2665_s30  ;;  %s3183_s9 = int_to_ptr.vmem [resolvable:$true] %s1768_s9 }
  0x60   : > { %2026 = vmatprep.subr.bf16.mxu0 %v2263_v1  ;;  %2169 = vmatprep.subr.bf16.mxu1 %v2263_v1  ;;  %v2278_v7 = vld [vmem:[%s2669_s8 + $0x100] sm:$0xff]   ;;  %v2269_v9 = vld [vmem:[#allocation5 + $0x38] sm:$0xff]   ;;  %v2271_v10 = vld [vmem:[%s2669_s8 + $0x8] sm:$0xff]   ;;  %s2392_s15 = scalar_lea.vmem %s3183_s9, 512  ;;  %s2484_s21 = smov [#allocation7]  }
  0x61   : > { %2040 = vmatprep.mubr.bf16.mxu0 %v2270_v4  ;;  %2104 = vmatprep.mubr.bf16.mxu1 %v2278_v7  ;;  %v2272_v11 = vld [vmem:[%s2669_s8 + $0x10] sm:$0xff]   ;;  %v2279_v12 = vld [vmem:[%s2669_s8 + $0x108] sm:$0xff]   ;;  %v2273_v14 = vld [vmem:[%s2669_s8 + $0x18] sm:$0xff]   ;;  %p2393_p4 = scmp.ne.s32.totalorder %s3183_s9, %s2392_s15  ;;  %s2396_s4 = sshll.u32 %s2484_s21, 4  ;;  %s2397_s4 = int_to_ptr.vmem [resolvable:$false] %s2396_s4 }
  0x62   : > { %v2282_v13 = vld [vmem:[%s2669_s8 + $0x110] sm:$0xff]   ;;  %v2274_v15 = vld [vmem:[%s2669_s8 + $0x20] sm:$0xff]   ;;  %v2283_v16 = vld [vmem:[%s2669_s8 + $0x118] sm:$0xff]   ;;  %s2398_s6 = scalar_lea.vmem %s2397_s4, 1024  ;;  %p2399_p12 = scmp.lt.s32.totalorder %s3183_s9, %s2397_s4 }
  0x63   : > { %2027 = vmatpush3.bf16.msra.mxu0 %v2263_v1  ;;  %2177 = vmatpush3.bf16.msra.mxu1 %v2263_v1  ;;  %v2286_v17 = vld [vmem:[%s2669_s8 + $0x120] sm:$0xff]   ;;  %v2275_v18 = vld [vmem:[%s2669_s8 + $0x28] sm:$0xff]   ;;  %v2276_v19 = vld [vmem:[%s2669_s8 + $0x30] sm:$0xff]   ;;  %p2394_p6 = pnand %p2393_p4, %p2606_p10  ;;  %p2400_p11 = scmp.lt.s32.totalorder %s2398_s6, %s2392_s15 }
  0x64   : > { %2028 = vmatprep.subr.bf16.mxu0 %v2264_v2  ;;  %2170 = vmatprep.subr.bf16.mxu1 %v2264_v2  ;;  %v2287_v20 = vld [vmem:[%s2669_s8 + $0x128] sm:$0xff]   ;;  %v2290_v21 = vld [vmem:[%s2669_s8 + $0x130] sm:$0xff]   ;;  %v2277_v22 = vld [vmem:[%s2669_s8 + $0x38] sm:$0xff]  }
  0x65   : > { %v2280_v23 = vld [vmem:[%s2669_s8 + $0x40] sm:$0xff]   ;;  %v2291_v24 = vld [vmem:[%s2669_s8 + $0x138] sm:$0xff]   ;;  %v2281_v26 = vld [vmem:[%s2669_s8 + $0x48] sm:$0xff]   ;;  %p2395_p8 = pneg %p2394_p6  ;;  %p2401_p0 = por %p2400_p11, %p2399_p12 }
  0x66   : > { %v2294_v25 = vld [vmem:[%s2669_s8 + $0x140] sm:$0xff]   ;;  %v2284_v27 = vld [vmem:[%s2669_s8 + $0x50] sm:$0xff]   ;;  %v2295_v28 = vld [vmem:[%s2669_s8 + $0x148] sm:$0xff]  }
  0x67   : > { %2029 = vmatpush3.bf16.msra.mxu0 %v2264_v2  ;;  %2178 = vmatpush3.bf16.msra.mxu1 %v2264_v2  ;;  %v2298_v29 = vld [vmem:[%s2669_s8 + $0x150] sm:$0xff]   ;;  %v2285_v30 = vld [vmem:[%s2669_s8 + $0x58] sm:$0xff]   ;;  %v2288_v31 = vld [vmem:[%s2669_s8 + $0x60] sm:$0xff]   ;;  %p2402_p5 = pnand %p2401_p0, %p2395_p8 }
  0x68   : > { %2030 = vmatprep.subr.bf16.mxu0 %v2265_v3  ;;  %2171 = vmatprep.subr.bf16.mxu1 %v2265_v3  ;;  %v2299_v32 = vld [vmem:[%s2669_s8 + $0x158] sm:$0xff]   ;;  %v2302_v33 = vld [vmem:[%s2669_s8 + $0x160] sm:$0xff]   ;;  %v2289_v34 = vld [vmem:[%s2669_s8 + $0x68] sm:$0xff]  }
  0x69   : > { %v2303_v35 = vld [vmem:[%s2669_s8 + $0x168] sm:$0xff]   ;;  %v2292_v36 = vld [vmem:[%s2669_s8 + $0x70] sm:$0xff]   ;;  %v2293_v38 = vld [vmem:[%s2669_s8 + $0x78] sm:$0xff]  }
  0x6a   : > { %v2306_v37 = vld [vmem:[%s2669_s8 + $0x170] sm:$0xff]   ;;  %v2307_v39 = vld [vmem:[%s2669_s8 + $0x178] sm:$0xff]   ;;  %v2296_v40 = vld [vmem:[%s2669_s8 + $0x80] sm:$0xff]  }
  0x6b   : > { %2031 = vmatpush3.bf16.msra.mxu0 %v2265_v3  ;;  %2179 = vmatpush3.bf16.msra.mxu1 %v2265_v3  ;;  %v2310_v41 = vld [vmem:[%s2669_s8 + $0x180] sm:$0xff]   ;;  %v2297_v42 = vld [vmem:[%s2669_s8 + $0x88] sm:$0xff]   ;;  %v2300_v44 = vld [vmem:[%s2669_s8 + $0x90] sm:$0xff]  }
  0x6c   : > { %2032 = vmatprep.subr.bf16.mxu0 %v2266_v5  ;;  %2172 = vmatprep.subr.bf16.mxu1 %v2266_v5  ;;  %v2311_v43 = vld [vmem:[%s2669_s8 + $0x188] sm:$0xff]   ;;  %v2314_v45 = vld [vmem:[%s2669_s8 + $0x190] sm:$0xff]   ;;  %v2301_v46 = vld [vmem:[%s2669_s8 + $0x98] sm:$0xff]  }
  0x6d   : > { %v2315_v47 = vld [vmem:[%s2669_s8 + $0x198] sm:$0xff]   ;;  %v2304_v48 = vld [vmem:[%s2669_s8 + $0xa0] sm:$0xff]   ;;  %v2305_v50 = vld [vmem:[%s2669_s8 + $0xa8] sm:$0xff]  }
  0x6e   : > { %v2318_v49 = vld [vmem:[%s2669_s8 + $0x1a0] sm:$0xff]   ;;  %v2319_v51 = vld [vmem:[%s2669_s8 + $0x1a8] sm:$0xff]   ;;  %v2308_v52 = vld [vmem:[%s2669_s8 + $0xb0] sm:$0xff]  }
  0x6f   : > { %2033 = vmatpush3.bf16.msra.mxu0 %v2266_v5  ;;  %2180 = vmatpush3.bf16.msra.mxu1 %v2266_v5  ;;  %v2322_v53 = vld [vmem:[%s2669_s8 + $0x1b0] sm:$0xff]   ;;  %v2309_v54 = vld [vmem:[%s2669_s8 + $0xb8] sm:$0xff]   ;;  %v2312_v56 = vld [vmem:[%s2669_s8 + $0xc0] sm:$0xff]  }
  0x70   : > { %2034 = vmatprep.subr.bf16.mxu0 %v2267_v6  ;;  %2173 = vmatprep.subr.bf16.mxu1 %v2267_v6  ;;  %v2323_v55 = vld [vmem:[%s2669_s8 + $0x1b8] sm:$0xff]   ;;  %v2326_v57 = vld [vmem:[%s2669_s8 + $0x1c0] sm:$0xff]   ;;  %v2313_v58 = vld [vmem:[%s2669_s8 + $0xc8] sm:$0xff]  }
  0x71   : > { %v2327_v59 = vld [vmem:[%s2669_s8 + $0x1c8] sm:$0xff]   ;;  %v2316_v60 = vld [vmem:[%s2669_s8 + $0xd0] sm:$0xff]   ;;  %v2317_v62 = vld [vmem:[%s2669_s8 + $0xd8] sm:$0xff]  }
  0x72   : > { %v2328_v61 = vld [vmem:[%s2669_s8 + $0x1d0] sm:$0xff]   ;;  %v2329_v63 = vld [vmem:[%s2669_s8 + $0x1d8] sm:$0xff]   ;;  %v2320_v0 = vld [vmem:[%s2669_s8 + $0xe0] sm:$0xff]  }
  0x73   : > { %2035 = vmatpush3.bf16.msra.mxu0 %v2267_v6  ;;  %2181 = vmatpush3.bf16.msra.mxu1 %v2267_v6  ;;  %v2330_v1 = vld [vmem:[%s2669_s8 + $0x1e0] sm:$0xff]   ;;  %v2321_v2 = vld [vmem:[%s2669_s8 + $0xe8] sm:$0xff]   ;;  %v2324_v4 = vld [vmem:[%s2669_s8 + $0xf0] sm:$0xff]  }
  0x74   : > { %2036 = vmatprep.subr.bf16.mxu0 %v2268_v8  ;;  %2174 = vmatprep.subr.bf16.mxu1 %v2268_v8  ;;  %v2331_v3 = vld [vmem:[%s2669_s8 + $0x1e8] sm:$0xff]   ;;  %v2332_v5 = vld [vmem:[%s2669_s8 + $0x1f0] sm:$0xff]   ;;  %v2325_v6 = vld [vmem:[%s2669_s8 + $0xf8] sm:$0xff]  }
  0x75   : > { %v2333_v7 = vld [vmem:[%s2669_s8 + $0x1f8] sm:$0xff]  }
  0x77   : > { %2037 = vmatpush3.bf16.msra.mxu0 %v2268_v8  ;;  %2182 = vmatpush3.bf16.msra.mxu1 %v2268_v8 }
  0x78   : > { %2038 = vmatprep.subr.bf16.mxu0 %v2269_v9  ;;  %2175 = vmatprep.subr.bf16.mxu1 %v2269_v9 }
  0x7b   : > { %2039 = vmatpush3.bf16.msra.mxu0 %v2269_v9  ;;  %2183 = vmatpush3.bf16.msra.mxu1 %v2269_v9 }
  0x7e   : > { %2041 = vmatmul.mubr.bf16.vlgmr.msra.gmra.mrb[0].mxu0 %v2271_v10  ;;  %2105 = vmatmul.mubr.bf16.vlgmr.msra.gmra.mrb[0].mxu1 %v2279_v12 }
  0x7f   : > { %2044 = vmatprep.mubr.bf16.mxu0 %v2272_v11  ;;  %2108 = vmatprep.mubr.bf16.mxu1 %v2282_v13 }
  0x86   : > { %2045 = vmatmul.mubr.bf16.gmra.mrb[4].mxu0 %v2273_v14  ;;  %2109 = vmatmul.mubr.bf16.gmra.mrb[4].mxu1 %v2283_v16  ;;  %v2754_v16 = vld [vmem:[%s3234_s2] ss:$0 sm:$0xff] }
  0x87   : > { %2048 = vmatprep.mubr.bf16.mxu0 %v2274_v15  ;;  %2112 = vmatprep.mubr.bf16.mxu1 %v2286_v17 }
  0x8e   : > { %2049 = vmatmul.mubr.bf16.gmra.mrb[8].mxu0 %v2275_v18  ;;  %2113 = vmatmul.mubr.bf16.gmra.mrb[8].mxu1 %v2287_v20 }
  0x8f   : > { %2052 = vmatprep.mubr.bf16.mxu0 %v2276_v19  ;;  %2116 = vmatprep.mubr.bf16.mxu1 %v2290_v21 }
  0x96   : > { %2053 = vmatmul.mubr.bf16.gmra.mrb[12].mxu0 %v2277_v22  ;;  %2117 = vmatmul.mubr.bf16.gmra.mrb[12].mxu1 %v2291_v24 }
  0x97   : > { %2056 = vmatprep.mubr.bf16.mxu0 %v2280_v23  ;;  %2120 = vmatprep.mubr.bf16.mxu1 %v2294_v25 }
  0x9e   : > { %2057 = vmatmul.mubr.bf16.gmra.mrb[16].mxu0 %v2281_v26  ;;  %2121 = vmatmul.mubr.bf16.gmra.mrb[16].mxu1 %v2295_v28 }
  0x9f   : > { %2060 = vmatprep.mubr.bf16.mxu0 %v2284_v27  ;;  %2124 = vmatprep.mubr.bf16.mxu1 %v2298_v29 }
  0xa6   : > { %2061 = vmatmul.mubr.bf16.gmra.mrb[20].mxu0 %v2285_v30  ;;  %2125 = vmatmul.mubr.bf16.gmra.mrb[20].mxu1 %v2299_v32 }
  0xa7   : > { %2064 = vmatprep.mubr.bf16.mxu0 %v2288_v31  ;;  %2128 = vmatprep.mubr.bf16.mxu1 %v2302_v33 }
  0xae   : > { %2065 = vmatmul.mubr.bf16.gmra.mrb[24].mxu0 %v2289_v34  ;;  %2129 = vmatmul.mubr.bf16.gmra.mrb[24].mxu1 %v2303_v35 }
  0xaf   : > { %2068 = vmatprep.mubr.bf16.mxu0 %v2292_v36  ;;  %2132 = vmatprep.mubr.bf16.mxu1 %v2306_v37 }
  0xb6   : > { %2069 = vmatmul.mubr.bf16.gmra.mrb[28].mxu0 %v2293_v38  ;;  %2133 = vmatmul.mubr.bf16.gmra.mrb[28].mxu1 %v2307_v39 }
  0xb7   : > { %2072 = vmatprep.mubr.bf16.mxu0 %v2296_v40  ;;  %2136 = vmatprep.mubr.bf16.mxu1 %v2310_v41 }
  0xbe   : > { %2073 = vmatmul.mubr.bf16.gmra.mrb[32].mxu0 %v2297_v42  ;;  %2137 = vmatmul.mubr.bf16.gmra.mrb[32].mxu1 %v2311_v43 }
  0xbf   : > { %2076 = vmatprep.mubr.bf16.mxu0 %v2300_v44  ;;  %2140 = vmatprep.mubr.bf16.mxu1 %v2314_v45 }
  0xc6   : > { %2077 = vmatmul.mubr.bf16.gmra.mrb[36].mxu0 %v2301_v46  ;;  %2141 = vmatmul.mubr.bf16.gmra.mrb[36].mxu1 %v2315_v47 }
  0xc7   : > { %2080 = vmatprep.mubr.bf16.mxu0 %v2304_v48  ;;  %2144 = vmatprep.mubr.bf16.mxu1 %v2318_v49 }
  0xce   : > { %2081 = vmatmul.mubr.bf16.gmra.mrb[40].mxu0 %v2305_v50  ;;  %2145 = vmatmul.mubr.bf16.gmra.mrb[40].mxu1 %v2319_v51 }
  0xcf   : > { %2084 = vmatprep.mubr.bf16.mxu0 %v2308_v52  ;;  %2148 = vmatprep.mubr.bf16.mxu1 %v2322_v53 }
  0xd6   : > { %2085 = vmatmul.mubr.bf16.gmra.mrb[44].mxu0 %v2309_v54  ;;  %2149 = vmatmul.mubr.bf16.gmra.mrb[44].mxu1 %v2323_v55 }
  0xd7   : > { %2088 = vmatprep.mubr.bf16.mxu0 %v2312_v56  ;;  %2152 = vmatprep.mubr.bf16.mxu1 %v2326_v57 }
  0xde   : > { %2089 = vmatmul.mubr.bf16.gmra.mrb[48].mxu0 %v2313_v58  ;;  %2153 = vmatmul.mubr.bf16.gmra.mrb[48].mxu1 %v2327_v59 }
  0xdf   : > { %2092 = vmatprep.mubr.bf16.mxu0 %v2316_v60  ;;  %2156 = vmatprep.mubr.bf16.mxu1 %v2328_v61 }
  0xe6   : > { %2093 = vmatmul.mubr.bf16.gmra.mrb[52].mxu0 %v2317_v62  ;;  %2157 = vmatmul.mubr.bf16.gmra.mrb[52].mxu1 %v2329_v63 }
  0xe7   : > { %2096 = vmatprep.mubr.bf16.mxu0 %v2320_v0  ;;  %2160 = vmatprep.mubr.bf16.mxu1 %v2330_v1 }
  0xee   : > { %2097 = vmatmul.mubr.bf16.gmra.mrb[56].mxu0 %v2321_v2  ;;  %2161 = vmatmul.mubr.bf16.gmra.mrb[56].mxu1 %v2331_v3 }
  0xef   : > { %2100 = vmatprep.mubr.bf16.mxu0 %v2324_v4  ;;  %2164 = vmatprep.mubr.bf16.mxu1 %v2332_v5 }
  0xf6   : > { %2101 = vmatmul.mubr.bf16.gmra.mrb[60].mxu0 %v2325_v6  ;;  %2165 = vmatmul.mubr.bf16.gmra.mrb[60].mxu1 %v2333_v7 }
 0x151   : > { %v2042_v8 = vpop.f32.mrb[0].mxu0  ;;  %v2743_v9 = vpop.f32.mrb[0].mxu1 }
 0x152   : > { %v841_v10 = vpop.f32.mrb[1].mxu0  ;;  %v2745_v11 = vpop.f32.mrb[1].mxu1  ;;  %v1360_v17 = vsub.f32 %v2042_v8, %v2754_v16 }
 0x153   : > { %v2043_v12 = vpop.f32.mrb[2].mxu0  ;;  %v2747_v13 = vpop.f32.mrb[2].mxu1  ;;  %v1358_v18 = vsub.f32 %v841_v10, %v2754_v16 }
 0x154   : > { %v844_v14 = vpop.f32.mrb[3].mxu0  ;;  %v2749_v15 = vpop.f32.mrb[3].mxu1  ;;  %v1361_v21 = vsub.f32 %v2043_v12, %v2754_v16  ;;  %v1488_v29 = vmul.f32 %v1360_v17, %v1360_v17 }
 0x155   : > { %v1359_v25 = vsub.f32 %v844_v14, %v2754_v16  ;;  %v1486_v34 = vmul.f32 %v1358_v18, %v1358_v18 }
 0x156   : > { %v1489_v37 = vmul.f32 %v1361_v21, %v1361_v21 }
 0x157   : > { %v1487_v40 = vmul.f32 %v1359_v25, %v1359_v25 }
 0x159   : > { %v2046_v19 = vpop.f32.mrb[4].mxu0  ;;  %v2758_v20 = vpop.f32.mrb[4].mxu1 }
 0x15a   : > { %v1364_v22 = vsub.f32 %v2046_v19, %v2754_v16  ;;  %v857_v23 = vpop.f32.mrb[5].mxu0  ;;  %v2762_v24 = vpop.f32.mrb[5].mxu1 }
 0x15b   : > { %v1362_v26 = vsub.f32 %v857_v23, %v2754_v16  ;;  %v2047_v27 = vpop.f32.mrb[6].mxu0  ;;  %v2766_v28 = vpop.f32.mrb[6].mxu1 }
 0x15c   : > { %v1492_v30 = vmul.f32 %v1364_v22, %v1364_v22  ;;  %v1365_v31 = vsub.f32 %v2047_v27, %v2754_v16  ;;  %v860_v32 = vpop.f32.mrb[7].mxu0  ;;  %v2769_v33 = vpop.f32.mrb[7].mxu1 }
 0x15d   : > { %v1490_v35 = vmul.f32 %v1362_v26, %v1362_v26  ;;  %v1363_v36 = vsub.f32 %v860_v32, %v2754_v16 }
 0x15e   : > { %v1676_v38 = vadd.f32 %v1492_v30, %v1488_v29  ;;  %v1493_v39 = vmul.f32 %v1365_v31, %v1365_v31 }
 0x15f   : > { %v1614_v41 = vadd.f32 %v1490_v35, %v1486_v34  ;;  %v1491_v42 = vmul.f32 %v1363_v36, %v1363_v36 }
 0x160   : > { %v1707_v43 = vadd.f32 %v1493_v39, %v1489_v37 }
 0x161   : > { %v1645_v44 = vadd.f32 %v1491_v42, %v1487_v40  ;;  %v2050_v45 = vpop.f32.mrb[8].mxu0  ;;  %v2772_v46 = vpop.f32.mrb[8].mxu1 }
 0x162   : > { %v1368_v47 = vsub.f32 %v2050_v45, %v2754_v16  ;;  %v873_v48 = vpop.f32.mrb[9].mxu0  ;;  %v2775_v49 = vpop.f32.mrb[9].mxu1 }
 0x163   : > { %v1366_v50 = vsub.f32 %v873_v48, %v2754_v16  ;;  %v2051_v51 = vpop.f32.mrb[10].mxu0  ;;  %v2778_v52 = vpop.f32.mrb[10].mxu1 }
 0x164   : > { %v1496_v53 = vmul.f32 %v1368_v47, %v1368_v47  ;;  %v1369_v54 = vsub.f32 %v2051_v51, %v2754_v16  ;;  %v876_v55 = vpop.f32.mrb[11].mxu0  ;;  %v2781_v56 = vpop.f32.mrb[11].mxu1 }
 0x165   : > { %v1494_v57 = vmul.f32 %v1366_v50, %v1366_v50  ;;  %v1367_v58 = vsub.f32 %v876_v55, %v2754_v16 }
 0x166   : > { %v1677_v59 = vadd.f32 %v1676_v38, %v1496_v53  ;;  %v1497_v60 = vmul.f32 %v1369_v54, %v1369_v54 }
 0x167   : > { %v1615_v61 = vadd.f32 %v1614_v41, %v1494_v57  ;;  %v1495_v62 = vmul.f32 %v1367_v58, %v1367_v58 }
 0x168   : > { %v1708_v63 = vadd.f32 %v1707_v43, %v1497_v60 }
 0x169   : > { %v1646_v0 = vadd.f32 %v1645_v44, %v1495_v62  ;;  %v2054_v1 = vpop.f32.mrb[12].mxu0  ;;  %v2784_v2 = vpop.f32.mrb[12].mxu1 }
 0x16a   : > { %v1372_v3 = vsub.f32 %v2054_v1, %v2754_v16  ;;  %v889_v4 = vpop.f32.mrb[13].mxu0  ;;  %v2787_v5 = vpop.f32.mrb[13].mxu1 }
 0x16b   : > { %v1370_v6 = vsub.f32 %v889_v4, %v2754_v16  ;;  %v2055_v7 = vpop.f32.mrb[14].mxu0  ;;  %v2790_v8 = vpop.f32.mrb[14].mxu1 }
 0x16c   : > { %v1500_v10 = vmul.f32 %v1372_v3, %v1372_v3  ;;  %v1373_v12 = vsub.f32 %v2055_v7, %v2754_v16  ;;  %v892_v14 = vpop.f32.mrb[15].mxu0  ;;  %v2793_v17 = vpop.f32.mrb[15].mxu1 }
 0x16d   : > { %v1498_v18 = vmul.f32 %v1370_v6, %v1370_v6  ;;  %v1371_v19 = vsub.f32 %v892_v14, %v2754_v16 }
 0x16e   : > { %v1678_v21 = vadd.f32 %v1677_v59, %v1500_v10  ;;  %v1501_v22 = vmul.f32 %v1373_v12, %v1373_v12 }
 0x16f   : > { %v1616_v23 = vadd.f32 %v1615_v61, %v1498_v18  ;;  %v1499_v25 = vmul.f32 %v1371_v19, %v1371_v19 }
 0x170   : > { %v1709_v26 = vadd.f32 %v1708_v63, %v1501_v22 }
 0x171   : > { %v1647_v27 = vadd.f32 %v1646_v0, %v1499_v25  ;;  %v2058_v29 = vpop.f32.mrb[16].mxu0  ;;  %v2796_v30 = vpop.f32.mrb[16].mxu1 }
 0x172   : > { %v1376_v31 = vsub.f32 %v2058_v29, %v2754_v16  ;;  %v905_v32 = vpop.f32.mrb[17].mxu0  ;;  %v2799_v34 = vpop.f32.mrb[17].mxu1 }
 0x173   : > { %v1374_v35 = vsub.f32 %v905_v32, %v2754_v16  ;;  %v2059_v36 = vpop.f32.mrb[18].mxu0  ;;  %v2802_v37 = vpop.f32.mrb[18].mxu1 }
 0x174   : > { %v1504_v38 = vmul.f32 %v1376_v31, %v1376_v31  ;;  %v1377_v39 = vsub.f32 %v2059_v36, %v2754_v16  ;;  %v908_v40 = vpop.f32.mrb[19].mxu0  ;;  %v2805_v41 = vpop.f32.mrb[19].mxu1 }
 0x175   : > { %v1502_v42 = vmul.f32 %v1374_v35, %v1374_v35  ;;  %v1375_v43 = vsub.f32 %v908_v40, %v2754_v16 }
 0x176   : > { %v1679_v44 = vadd.f32 %v1678_v21, %v1504_v38  ;;  %v1505_v45 = vmul.f32 %v1377_v39, %v1377_v39 }
 0x177   : > { %v1617_v47 = vadd.f32 %v1616_v23, %v1502_v42  ;;  %v1503_v48 = vmul.f32 %v1375_v43, %v1375_v43 }
 0x178   : > { %v1710_v50 = vadd.f32 %v1709_v26, %v1505_v45 }
 0x179   : > { %v1648_v51 = vadd.f32 %v1647_v27, %v1503_v48  ;;  %v2062_v53 = vpop.f32.mrb[20].mxu0  ;;  %v2808_v54 = vpop.f32.mrb[20].mxu1 }
 0x17a   : > { %v1380_v55 = vsub.f32 %v2062_v53, %v2754_v16  ;;  %v921_v57 = vpop.f32.mrb[21].mxu0  ;;  %v2811_v58 = vpop.f32.mrb[21].mxu1 }
 0x17b   : > { %v1378_v59 = vsub.f32 %v921_v57, %v2754_v16  ;;  %v2063_v60 = vpop.f32.mrb[22].mxu0  ;;  %v2814_v61 = vpop.f32.mrb[22].mxu1 }
 0x17c   : > { %v1508_v62 = vmul.f32 %v1380_v55, %v1380_v55  ;;  %v1381_v63 = vsub.f32 %v2063_v60, %v2754_v16  ;;  %v924_v0 = vpop.f32.mrb[23].mxu0  ;;  %v2817_v1 = vpop.f32.mrb[23].mxu1 }
 0x17d   : > { %v1506_v3 = vmul.f32 %v1378_v59, %v1378_v59  ;;  %v1379_v4 = vsub.f32 %v924_v0, %v2754_v16 }
 0x17e   : > { %v1680_v6 = vadd.f32 %v1679_v44, %v1508_v62  ;;  %v1509_v7 = vmul.f32 %v1381_v63, %v1381_v63 }
 0x17f   : > { %v1618_v10 = vadd.f32 %v1617_v47, %v1506_v3  ;;  %v1507_v12 = vmul.f32 %v1379_v4, %v1379_v4 }
 0x180   : > { %v1711_v14 = vadd.f32 %v1710_v50, %v1509_v7 }
 0x181   : > { %v1649_v18 = vadd.f32 %v1648_v51, %v1507_v12  ;;  %v2066_v19 = vpop.f32.mrb[24].mxu0  ;;  %v2820_v21 = vpop.f32.mrb[24].mxu1 }
 0x182   : > { %v1384_v22 = vsub.f32 %v2066_v19, %v2754_v16  ;;  %v937_v23 = vpop.f32.mrb[25].mxu0  ;;  %v2823_v25 = vpop.f32.mrb[25].mxu1 }
 0x183   : > { %v1382_v26 = vsub.f32 %v937_v23, %v2754_v16  ;;  %v2067_v27 = vpop.f32.mrb[26].mxu0  ;;  %v2826_v29 = vpop.f32.mrb[26].mxu1 }
 0x184   : > { %v1512_v31 = vmul.f32 %v1384_v22, %v1384_v22  ;;  %v1385_v32 = vsub.f32 %v2067_v27, %v2754_v16  ;;  %v940_v35 = vpop.f32.mrb[27].mxu0  ;;  %v2829_v36 = vpop.f32.mrb[27].mxu1 }
 0x185   : > { %v1510_v38 = vmul.f32 %v1382_v26, %v1382_v26  ;;  %v1383_v39 = vsub.f32 %v940_v35, %v2754_v16 }
 0x186   : > { %v1681_v40 = vadd.f32 %v1680_v6, %v1512_v31  ;;  %v1513_v42 = vmul.f32 %v1385_v32, %v1385_v32 }
 0x187   : > { %v1619_v43 = vadd.f32 %v1618_v10, %v1510_v38  ;;  %v1511_v44 = vmul.f32 %v1383_v39, %v1383_v39 }
 0x188   : > { %v1712_v45 = vadd.f32 %v1711_v14, %v1513_v42 }
 0x189   : > { %v1650_v47 = vadd.f32 %v1649_v18, %v1511_v44  ;;  %v2070_v48 = vpop.f32.mrb[28].mxu0  ;;  %v2832_v50 = vpop.f32.mrb[28].mxu1 }
 0x18a   : > { %v1388_v51 = vsub.f32 %v2070_v48, %v2754_v16  ;;  %v953_v53 = vpop.f32.mrb[29].mxu0  ;;  %v2835_v55 = vpop.f32.mrb[29].mxu1 }
 0x18b   : > { %v1386_v57 = vsub.f32 %v953_v53, %v2754_v16  ;;  %v2071_v59 = vpop.f32.mrb[30].mxu0  ;;  %v2838_v60 = vpop.f32.mrb[30].mxu1 }
 0x18c   : > { %v1516_v62 = vmul.f32 %v1388_v51, %v1388_v51  ;;  %v1389_v63 = vsub.f32 %v2071_v59, %v2754_v16  ;;  %v956_v0 = vpop.f32.mrb[31].mxu0  ;;  %v2841_v3 = vpop.f32.mrb[31].mxu1 }
 0x18d   : > { %v1514_v4 = vmul.f32 %v1386_v57, %v1386_v57  ;;  %v1387_v6 = vsub.f32 %v956_v0, %v2754_v16 }
 0x18e   : > { %v1682_v7 = vadd.f32 %v1681_v40, %v1516_v62  ;;  %v1517_v10 = vmul.f32 %v1389_v63, %v1389_v63 }
 0x18f   : > { %v1620_v12 = vadd.f32 %v1619_v43, %v1514_v4  ;;  %v1515_v14 = vmul.f32 %v1387_v6, %v1387_v6 }
 0x190   : > { %v1713_v18 = vadd.f32 %v1712_v45, %v1517_v10 }
 0x191   : > { %v1651_v19 = vadd.f32 %v1650_v47, %v1515_v14  ;;  %v2074_v22 = vpop.f32.mrb[32].mxu0  ;;  %v2844_v23 = vpop.f32.mrb[32].mxu1 }
 0x192   : > { %v1392_v26 = vsub.f32 %v2074_v22, %v2754_v16  ;;  %v969_v27 = vpop.f32.mrb[33].mxu0  ;;  %v2847_v31 = vpop.f32.mrb[33].mxu1 }
 0x193   : > { %v1390_v32 = vsub.f32 %v969_v27, %v2754_v16  ;;  %v2075_v35 = vpop.f32.mrb[34].mxu0  ;;  %v2850_v38 = vpop.f32.mrb[34].mxu1 }
 0x194   : > { %v1520_v39 = vmul.f32 %v1392_v26, %v1392_v26  ;;  %v1393_v40 = vsub.f32 %v2075_v35, %v2754_v16  ;;  %v972_v42 = vpop.f32.mrb[35].mxu0  ;;  %v2853_v43 = vpop.f32.mrb[35].mxu1 }
 0x195   : > { %v1518_v44 = vmul.f32 %v1390_v32, %v1390_v32  ;;  %v1391_v45 = vsub.f32 %v972_v42, %v2754_v16 }
 0x196   : > { %v1683_v47 = vadd.f32 %v1682_v7, %v1520_v39  ;;  %v1521_v48 = vmul.f32 %v1393_v40, %v1393_v40 }
 0x197   : > { %v1621_v51 = vadd.f32 %v1620_v12, %v1518_v44  ;;  %v1519_v53 = vmul.f32 %v1391_v45, %v1391_v45 }
 0x198   : > { %v1714_v57 = vadd.f32 %v1713_v18, %v1521_v48 }
 0x199   : > { %v1652_v59 = vadd.f32 %v1651_v19, %v1519_v53  ;;  %v2078_v62 = vpop.f32.mrb[36].mxu0  ;;  %v2856_v63 = vpop.f32.mrb[36].mxu1 }
 0x19a   : > { %v1396_v0 = vsub.f32 %v2078_v62, %v2754_v16  ;;  %v985_v4 = vpop.f32.mrb[37].mxu0  ;;  %v2859_v6 = vpop.f32.mrb[37].mxu1 }
 0x19b   : > { %v1394_v10 = vsub.f32 %v985_v4, %v2754_v16  ;;  %v2079_v14 = vpop.f32.mrb[38].mxu0  ;;  %v2862_v22 = vpop.f32.mrb[38].mxu1 }
 0x19c   : > { %v1524_v26 = vmul.f32 %v1396_v0, %v1396_v0  ;;  %v1397_v7 = vsub.f32 %v2079_v14, %v2754_v16  ;;  %v988_v12 = vpop.f32.mrb[39].mxu0  ;;  %v2865_v27 = vpop.f32.mrb[39].mxu1 }
 0x19d   : > { %v1522_v18 = vmul.f32 %v1394_v10, %v1394_v10  ;;  %v1395_v19 = vsub.f32 %v988_v12, %v2754_v16 }
 0x19e   : > { %v1684_v32 = vadd.f32 %v1683_v47, %v1524_v26  ;;  %v1525_v35 = vmul.f32 %v1397_v7, %v1397_v7 }
 0x19f   : > { %v1622_v39 = vadd.f32 %v1621_v51, %v1522_v18  ;;  %v1523_v40 = vmul.f32 %v1395_v19, %v1395_v19 }
 0x1a0   : > { %v1715_v42 = vadd.f32 %v1714_v57, %v1525_v35 }
 0x1a1   : > { %v1653_v44 = vadd.f32 %v1652_v59, %v1523_v40  ;;  %v2082_v45 = vpop.f32.mrb[40].mxu0  ;;  %v2868_v48 = vpop.f32.mrb[40].mxu1 }
 0x1a2   : > { %3253 = vst [vmem:[#allocation11_spill] sm:$0xff] %v2868_v48  ;;  %v1400_v53 = vsub.f32 %v2082_v45, %v2754_v16  ;;  %v1001_v62 = vpop.f32.mrb[41].mxu0  ;;  %v2871_v0 = vpop.f32.mrb[41].mxu1 }
 0x1a3   : > { %3254 = vst [vmem:[#allocation12_spill] sm:$0xff] %v2871_v0  ;;  %v1398_v4 = vsub.f32 %v1001_v62, %v2754_v16  ;;  %v2083_v14 = vpop.f32.mrb[42].mxu0  ;;  %v2874_v10 = vpop.f32.mrb[42].mxu1 }
 0x1a4   : > { %3255 = vst [vmem:[#allocation13_spill] sm:$0xff] %v2874_v10  ;;  %v1528_v12 = vmul.f32 %v1400_v53, %v1400_v53  ;;  %v1401_v47 = vsub.f32 %v2083_v14, %v2754_v16  ;;  %v1004_v51 = vpop.f32.mrb[43].mxu0  ;;  %v2877_v26 = vpop.f32.mrb[43].mxu1 }
 0x1a5   : > { %3256 = vst [vmem:[#allocation14_spill] sm:$0xff] %v2877_v26  ;;  %v1526_v57 = vmul.f32 %v1398_v4, %v1398_v4  ;;  %v1399_v59 = vsub.f32 %v1004_v51, %v2754_v16 }
 0x1a6   : > { %v1685_v7 = vadd.f32 %v1684_v32, %v1528_v12  ;;  %v1529_v18 = vmul.f32 %v1401_v47, %v1401_v47 }
 0x1a7   : > { %v1623_v19 = vadd.f32 %v1622_v39, %v1526_v57  ;;  %v1527_v35 = vmul.f32 %v1399_v59, %v1399_v59 }
 0x1a8   : > { %v1716_v40 = vadd.f32 %v1715_v42, %v1529_v18 }
 0x1a9   : > { %v1654_v45 = vadd.f32 %v1653_v44, %v1527_v35  ;;  %v2086_v0 = vpop.f32.mrb[44].mxu0  ;;  %v2880_v62 = vpop.f32.mrb[44].mxu1 }
 0x1aa   : > { %3257 = vst [vmem:[#allocation15_spill] sm:$0xff] %v2880_v62  ;;  %v1404_v10 = vsub.f32 %v2086_v0, %v2754_v16  ;;  %v1017_v53 = vpop.f32.mrb[45].mxu0  ;;  %v2883_v48 = vpop.f32.mrb[45].mxu1 }
 0x1ab   : > { %3258 = vst [vmem:[#allocation16_spill] sm:$0xff] %v2883_v48  ;;  %v1402_v14 = vsub.f32 %v1017_v53, %v2754_v16  ;;  %v2087_v26 = vpop.f32.mrb[46].mxu0  ;;  %v2886_v4 = vpop.f32.mrb[46].mxu1 }
 0x1ac   : > { %3259 = vst [vmem:[#allocation17_spill] sm:$0xff] %v2886_v4  ;;  %v1532_v51 = vmul.f32 %v1404_v10, %v1404_v10  ;;  %v1405_v32 = vsub.f32 %v2087_v26, %v2754_v16  ;;  %v1020_v39 = vpop.f32.mrb[47].mxu0  ;;  %v2889_v12 = vpop.f32.mrb[47].mxu1  ;;  %v1424_v26 = vsub.f32 %v2743_v9, %v2754_v16  ;;  %v1428_v9 = vsub.f32 %v2758_v20, %v2754_v16 }
 0x1ad   : > { %v1530_v42 = vmul.f32 %v1402_v14, %v1402_v14  ;;  %v1403_v44 = vsub.f32 %v1020_v39, %v2754_v16  ;;  %v1422_v14 = vsub.f32 %v2745_v11, %v2754_v16  ;;  %v1426_v11 = vsub.f32 %v2762_v24, %v2754_v16 }
 0x1ae   : > { %v1686_v47 = vadd.f32 %v1685_v7, %v1532_v51  ;;  %v1533_v57 = vmul.f32 %v1405_v32, %v1405_v32 }
 0x1af   : > { %v1624_v0 = vadd.f32 %v1623_v19, %v1530_v42  ;;  %v1531_v59 = vmul.f32 %v1403_v44, %v1403_v44 }
 0x1b0   : > { %v1717_v18 = vadd.f32 %v1716_v40, %v1533_v57  ;;  %v1425_v40 = vsub.f32 %v2747_v13, %v2754_v16  ;;  %v1429_v13 = vsub.f32 %v2766_v28, %v2754_v16 }
 0x1b1   : > { %v1655_v35 = vadd.f32 %v1654_v45, %v1531_v59  ;;  %v2090_v48 = vpop.f32.mrb[48].mxu0  ;;  %v2892_v53 = vpop.f32.mrb[48].mxu1 }
 0x1b2   : > { %3260 = vst [vmem:[#allocation18_spill] sm:$0xff] %v2892_v53  ;;  %v1408_v4 = vsub.f32 %v2090_v48, %v2754_v16  ;;  %v1033_v10 = vpop.f32.mrb[49].mxu0  ;;  %v2895_v62 = vpop.f32.mrb[49].mxu1  ;;  %v1423_v48 = vsub.f32 %v2749_v15, %v2754_v16  ;;  %v1427_v15 = vsub.f32 %v2769_v33, %v2754_v16  ;;  %v2924_v20 = vmul.f32 %v1425_v40, %v1425_v40 }
 0x1b3   : > { %3261 = vst [vmem:[#allocation19_spill] sm:$0xff] %v2895_v62  ;;  %v1406_v7 = vsub.f32 %v1033_v10, %v2754_v16  ;;  %v2091_v19 = vpop.f32.mrb[50].mxu0  ;;  %v2902_v51 = vpop.f32.mrb[50].mxu1  ;;  %v2930_v62 = vmul.f32 %v1426_v11, %v1426_v11 }
 0x1b4   : > { %3262 = vst [vmem:[#allocation20_spill] sm:$0xff] %v2902_v51  ;;  %v1536_v45 = vmul.f32 %v1408_v4, %v1408_v4  ;;  %v1409_v32 = vsub.f32 %v2091_v19, %v2754_v16  ;;  %v1036_v39 = vpop.f32.mrb[51].mxu0  ;;  %v2909_v42 = vpop.f32.mrb[51].mxu1  ;;  %v2922_v51 = vmul.f32 %v1422_v14, %v1422_v14 }
 0x1b5   : > { %3263 = vst [vmem:[#allocation21_spill] sm:$0xff] %v2909_v42  ;;  %v1534_v44 = vmul.f32 %v1406_v7, %v1406_v7  ;;  %v1407_v57 = vsub.f32 %v1036_v39, %v2754_v16  ;;  %v2920_v42 = vmul.f32 %v1424_v26, %v1424_v26  ;;  %v2926_v7 = vmul.f32 %v1423_v48, %v1423_v48 }
 0x1b6   : > { %v1687_v4 = vadd.f32 %v1686_v47, %v1536_v45  ;;  %v1537_v59 = vmul.f32 %v1409_v32, %v1409_v32  ;;  %v2928_v39 = vmul.f32 %v1428_v9, %v1428_v9  ;;  %v2934_v47 = vmul.f32 %v1429_v13, %v1429_v13 }
 0x1b7   : > { %v1625_v10 = vadd.f32 %v1624_v0, %v1534_v44  ;;  %v1535_v19 = vmul.f32 %v1407_v57, %v1407_v57  ;;  %v2936_v0 = vmul.f32 %v1427_v15, %v1427_v15  ;;  %v1432_v26 = vsub.f32 %v2772_v46, %v2754_v16 }
 0x1b8   : > { %v1718_v24 = vadd.f32 %v1717_v18, %v1537_v59  ;;  %v1430_v48 = vsub.f32 %v2775_v49, %v2754_v16  ;;  %v1431_v45 = vsub.f32 %v2781_v56, %v2754_v16  ;;  %v1436_v46 = vsub.f32 %v2784_v2, %v2754_v16 }
 0x1b9   : > { %v1656_v28 = vadd.f32 %v1655_v35, %v1535_v19  ;;  %v2094_v53 = vpop.f32.mrb[52].mxu0  ;;  %v2932_v33 = vpop.f32.mrb[52].mxu1  ;;  %v1433_v35 = vsub.f32 %v2778_v52, %v2754_v16  ;;  %v1437_v52 = vsub.f32 %v2790_v8, %v2754_v16  ;;  %v1435_v56 = vsub.f32 %v2793_v17, %v2754_v16 }
 0x1ba   : > { %v1412_v14 = vsub.f32 %v2094_v53, %v2754_v16  ;;  %v1049_v18 = vpop.f32.mrb[53].mxu0  ;;  %v2941_v40 = vpop.f32.mrb[53].mxu1  ;;  %v1434_v53 = vsub.f32 %v2787_v5, %v2754_v16  ;;  %v1440_v2 = vsub.f32 %v2796_v30, %v2754_v16  ;;  %v1438_v5 = vsub.f32 %v2799_v34, %v2754_v16 }
 0x1bb   : > { %v1410_v32 = vsub.f32 %v1049_v18, %v2754_v16  ;;  %v2095_v9 = vpop.f32.mrb[54].mxu0  ;;  %v2950_v11 = vpop.f32.mrb[54].mxu1  ;;  %v1441_v18 = vsub.f32 %v2802_v37, %v2754_v16  ;;  %v1439_v8 = vsub.f32 %v2805_v41, %v2754_v16  ;;  %v2972_v17 = vmul.f32 %v1432_v26, %v1432_v26 }
 0x1bc   : > { %3264 = vst [vmem:[#allocation22_spill] sm:$0xff] %v2950_v11  ;;  %v1540_v44 = vmul.f32 %v1412_v14, %v1412_v14  ;;  %v1413_v49 = vsub.f32 %v2095_v9, %v2754_v16  ;;  %v1052_v57 = vpop.f32.mrb[55].mxu0  ;;  %v2957_v13 = vpop.f32.mrb[55].mxu1  ;;  %v2978_v11 = vmul.f32 %v1431_v45, %v1431_v45  ;;  %v2980_v34 = vmul.f32 %v1436_v46, %v1436_v46 }
 0x1bd   : > { %3265 = vst [vmem:[#allocation23_spill] sm:$0xff] %v2957_v13  ;;  %v1538_v15 = vmul.f32 %v1410_v32, %v1410_v32  ;;  %v1411_v59 = vsub.f32 %v1052_v57, %v2754_v16  ;;  %v2974_v32 = vmul.f32 %v1430_v48, %v1430_v48  ;;  %v2976_v57 = vmul.f32 %v1433_v35, %v1433_v35 }
 0x1be   : > { %v1688_v19 = vadd.f32 %v1687_v4, %v1540_v44  ;;  %v1541_v14 = vmul.f32 %v1413_v49, %v1413_v49  ;;  %v2982_v4 = vmul.f32 %v1434_v53, %v1434_v53  ;;  %v2986_v41 = vmul.f32 %v1437_v52, %v1437_v52 }
 0x1bf   : > { %v1626_v9 = vadd.f32 %v1625_v10, %v1538_v15  ;;  %v1539_v13 = vmul.f32 %v1411_v59, %v1411_v59  ;;  %v2988_v10 = vmul.f32 %v1435_v56, %v1435_v56  ;;  %v2990_v26 = vmul.f32 %v1440_v2, %v1440_v2 }
 0x1c0   : > { %v1719_v30 = vadd.f32 %v1718_v24, %v1541_v14  ;;  %v2995_v45 = vmul.f32 %v1438_v5, %v1438_v5  ;;  %v2997_v46 = vmul.f32 %v1441_v18, %v1441_v18  ;;  %v2999_v53 = vmul.f32 %v1439_v8, %v1439_v8 }
 0x1c1   : > { %v1657_v44 = vadd.f32 %v1656_v28, %v1539_v13  ;;  %v2098_v37 = vpop.f32.mrb[56].mxu0  ;;  %v2984_v49 = vpop.f32.mrb[56].mxu1  ;;  %v1444_v56 = vsub.f32 %v2808_v54, %v2754_v16  ;;  %v1442_v15 = vsub.f32 %v2811_v58, %v2754_v16  ;;  %v1445_v18 = vsub.f32 %v2814_v61, %v2754_v16 }
 0x1c2   : > { %3266 = vst [vmem:[#allocation24_spill] sm:$0xff] %v2984_v49  ;;  %v1416_v48 = vsub.f32 %v2098_v37, %v2754_v16  ;;  %v1065_v35 = vpop.f32.mrb[57].mxu0  ;;  %v2993_v24 = vpop.f32.mrb[57].mxu1  ;;  %v1443_v8 = vsub.f32 %v2817_v1, %v2754_v16  ;;  %v1448_v54 = vsub.f32 %v2820_v21, %v2754_v16  ;;  %v1446_v58 = vsub.f32 %v2823_v25, %v2754_v16 }
 0x1c3   : > { %3267 = vst [vmem:[#allocation25_spill] sm:$0xff] %v2993_v24  ;;  %v1414_v28 = vsub.f32 %v1065_v35, %v2754_v16  ;;  %v2099_v13 = vpop.f32.mrb[58].mxu0  ;;  %v3002_v52 = vpop.f32.mrb[58].mxu1  ;;  %v1447_v61 = vsub.f32 %v2829_v36, %v2754_v16  ;;  %v3024_v1 = vmul.f32 %v1444_v56, %v1444_v56  ;;  %v1452_v21 = vsub.f32 %v2832_v50, %v2754_v16 }
 0x1c4   : > { %3268 = vst [vmem:[#allocation26_spill] sm:$0xff] %v3002_v52  ;;  %v1544_v59 = vmul.f32 %v1416_v48, %v1416_v48  ;;  %v1417_v2 = vsub.f32 %v2099_v13, %v2754_v16  ;;  %v1068_v5 = vpop.f32.mrb[59].mxu0  ;;  %v3009_v14 = vpop.f32.mrb[59].mxu1  ;;  %v3030_v49 = vmul.f32 %v1445_v18, %v1445_v18  ;;  %v3032_v25 = vmul.f32 %v1443_v8, %v1443_v8 }
 0x1c5   : > { %3269 = vst [vmem:[#allocation27_spill] sm:$0xff] %v3009_v14  ;;  %v1542_v37 = vmul.f32 %v1414_v28, %v1414_v28  ;;  %v1415_v35 = vsub.f32 %v1068_v5, %v2754_v16  ;;  %v1449_v14 = vsub.f32 %v2826_v29, %v2754_v16  ;;  %v3026_v28 = vmul.f32 %v1442_v15, %v1442_v15 }
 0x1c6   : > { %v1689_v48 = vadd.f32 %v1688_v19, %v1544_v59  ;;  %v1545_v13 = vmul.f32 %v1417_v2, %v1417_v2  ;;  %v1450_v29 = vsub.f32 %v2835_v55, %v2754_v16  ;;  %v3040_v56 = vmul.f32 %v1446_v58, %v1446_v58 }
 0x1c7   : > { %v1627_v52 = vadd.f32 %v1626_v9, %v1542_v37  ;;  %v1543_v24 = vmul.f32 %v1415_v35, %v1415_v35  ;;  %v3038_v9 = vmul.f32 %v1448_v54, %v1448_v54  ;;  %v1453_v15 = vsub.f32 %v2838_v60, %v2754_v16 }
 0x1c8   : > { %v1720_v5 = vadd.f32 %v1719_v30, %v1545_v13  ;;  %v3047_v18 = vmul.f32 %v1449_v14, %v1449_v14  ;;  %v3049_v8 = vmul.f32 %v1447_v61, %v1447_v61  ;;  %v1451_v55 = vsub.f32 %v2841_v3, %v2754_v16 }
 0x1c9   : > { %v1658_v19 = vadd.f32 %v1657_v44, %v1543_v24  ;;  %v2102_v59 = vpop.f32.mrb[60].mxu0  ;;  %v3036_v36 = vpop.f32.mrb[60].mxu1  ;;  %v3056_v35 = vmul.f32 %v1452_v21, %v1452_v21  ;;  %v1456_v60 = vsub.f32 %v2844_v23, %v2754_v16  ;;  %v3063_v61 = vmul.f32 %v1450_v29, %v1450_v29 }
 0x1ca   : > { %3270 = vst [vmem:[#allocation28_spill] sm:$0xff] %v3036_v36  ;;  %v1420_v50 = vsub.f32 %v2102_v59, %v2754_v16  ;;  %v1081_v30 = vpop.f32.mrb[61].mxu0  ;;  %v3045_v2 = vpop.f32.mrb[61].mxu1  ;;  %v1454_v3 = vsub.f32 %v2847_v31, %v2754_v16  ;;  %v1457_v21 = vsub.f32 %v2850_v38, %v2754_v16  ;;  %v1460_v31 = vsub.f32 %v2856_v63, %v2754_v16 }
 0x1cb   : > { %3271 = vst [vmem:[#allocation29_spill] sm:$0xff] %v3045_v2  ;;  %v1418_v44 = vsub.f32 %v1081_v30, %v2754_v16  ;;  %v2103_v24 = vpop.f32.mrb[62].mxu0  ;;  %v3054_v37 = vpop.f32.mrb[62].mxu1  ;;  %v3072_v2 = vmul.f32 %v1451_v55, %v1451_v55  ;;  %v3076_v36 = vmul.f32 %v1456_v60, %v1456_v60  ;;  %v1458_v38 = vsub.f32 %v2859_v6, %v2754_v16 }
 0x1cc   : > { %3272 = vst [vmem:[#allocation30_spill] sm:$0xff] %v3054_v37  ;;  %v1548_v54 = vmul.f32 %v1420_v50, %v1420_v50  ;;  %v1421_v58 = vsub.f32 %v2103_v24, %v2754_v16  ;;  %v1084_v14 = vpop.f32.mrb[63].mxu0  ;;  %v3061_v13 = vpop.f32.mrb[63].mxu1  ;;  %v3068_v37 = vmul.f32 %v1453_v15, %v1453_v15  ;;  %v1455_v24 = vsub.f32 %v2853_v43, %v2754_v16 }
 0x1cd   : > { %3273 = vst [vmem:[#allocation31_spill] sm:$0xff] %v3061_v13  ;;  %v1546_v59 = vmul.f32 %v1418_v44, %v1418_v44  ;;  %v1419_v30 = vsub.f32 %v1084_v14, %v2754_v16  ;;  %v3081_v14 = vmul.f32 %v1454_v3, %v1454_v3  ;;  %v1461_v43 = vsub.f32 %v2862_v22, %v2754_v16 }
 0x1ce   : > { %v1690_v23 = vadd.f32 %v1689_v48, %v1548_v54  ;;  %v1549_v50 = vmul.f32 %v1421_v58, %v1421_v58  ;;  %v3086_v54 = vmul.f32 %v1457_v21, %v1457_v21  ;;  %v3092_v60 = vmul.f32 %v1455_v24, %v1455_v24 }
 0x1cf   : > { %v1628_v29 = vadd.f32 %v1627_v52, %v1546_v59  ;;  %v1547_v13 = vmul.f32 %v1419_v30, %v1419_v30  ;;  %v1589_v30 = vmul.f32 %v1461_v43, %v1461_v43 }
 0x1d0   : > { %v1691_v15 = vadd.f32 %v1690_v23, %v2920_v42  ;;  %v1721_v44 = vadd.f32 %v1720_v5, %v1549_v50  ;;  %v1459_v42 = vsub.f32 %v2865_v27, %v2754_v16 }
 0x1d1   : > { %v1629_v48 = vadd.f32 %v1628_v29, %v2922_v51  ;;  %v1659_v55 = vadd.f32 %v1658_v19, %v1547_v13  ;;  %v1588_v51 = vmul.f32 %v1460_v31, %v1460_v31  ;;  %v3274_v19 = vld [vmem:[#allocation11_spill] sm:$0xff] }
 0x1d2   : > { %v1692_v52 = vadd.f32 %v1691_v15, %v2928_v39  ;;  %v1722_v63 = vadd.f32 %v1721_v44, %v2924_v20  ;;  %v1464_v58 = vsub.f32 %v3274_v19, %v2754_v16  ;;  %v1586_v39 = vmul.f32 %v1458_v38, %v1458_v38  ;;  %v3275_v20 = vld [vmem:[#allocation12_spill] sm:$0xff] }
 0x1d3   : > { %v1630_v5 = vadd.f32 %v1629_v48, %v2930_v62  ;;  %v1660_v6 = vadd.f32 %v1659_v55, %v2926_v7  ;;  %v1462_v3 = vsub.f32 %v3275_v20, %v2754_v16  ;;  %v3276_v62 = vld [vmem:[#allocation13_spill] sm:$0xff]  ;;  %v1587_v50 = vmul.f32 %v1459_v42, %v1459_v42 }
 0x1d4   : > { %v1693_v13 = vadd.f32 %v1692_v52, %v2972_v17  ;;  %v1723_v22 = vadd.f32 %v1722_v63, %v2934_v47  ;;  %v1465_v7 = vsub.f32 %v3276_v62, %v2754_v16  ;;  %v3277_v17 = vld [vmem:[#allocation14_spill] sm:$0xff]  ;;  %v1592_v31 = vmul.f32 %v1464_v58, %v1464_v58 }
 0x1d5   : > { %v1631_v59 = vadd.f32 %v1630_v5, %v2974_v32  ;;  %v1661_v27 = vadd.f32 %v1660_v6, %v2936_v0  ;;  %v1463_v47 = vsub.f32 %v3277_v17, %v2754_v16  ;;  %v3278_v32 = vld [vmem:[#allocation15_spill] sm:$0xff]  ;;  %v1590_v38 = vmul.f32 %v1462_v3, %v1462_v3 }
 0x1d6   : > { %v1694_v21 = vadd.f32 %v1693_v13, %v2980_v34  ;;  %v1724_v23 = vadd.f32 %v1723_v22, %v2976_v57  ;;  %v1468_v0 = vsub.f32 %v3278_v32, %v2754_v16  ;;  %v3279_v34 = vld [vmem:[#allocation16_spill] sm:$0xff]  ;;  %v1593_v43 = vmul.f32 %v1465_v7, %v1465_v7 }
 0x1d7   : > { %v1632_v24 = vadd.f32 %v1631_v59, %v2982_v4  ;;  %v1662_v29 = vadd.f32 %v1661_v27, %v2978_v11  ;;  %v1466_v57 = vsub.f32 %v3279_v34, %v2754_v16  ;;  %v3280_v4 = vld [vmem:[#allocation17_spill] sm:$0xff]  ;;  %v1591_v42 = vmul.f32 %v1463_v47, %v1463_v47  ;;  %v3287_v34 = vld [vmem:[#allocation24_spill] sm:$0xff] }
 0x1d8   : > { %v1695_v15 = vadd.f32 %v1694_v21, %v2990_v26  ;;  %v1725_v44 = vadd.f32 %v1724_v23, %v2986_v41  ;;  %v1469_v11 = vsub.f32 %v3280_v4, %v2754_v16  ;;  %v1467_v41 = vsub.f32 %v2889_v12, %v2754_v16 }
 0x1d9   : > { %v1633_v48 = vadd.f32 %v1632_v24, %v2995_v45  ;;  %v1663_v55 = vadd.f32 %v1662_v29, %v2988_v10  ;;  %v1596_v6 = vmul.f32 %v1468_v0, %v1468_v0  ;;  %v3281_v10 = vld [vmem:[#allocation18_spill] sm:$0xff]  ;;  %v1594_v13 = vmul.f32 %v1466_v57, %v1466_v57 }
 0x1da   : > { %v1696_v52 = vadd.f32 %v1695_v15, %v3024_v1  ;;  %v1726_v63 = vadd.f32 %v1725_v44, %v2997_v46  ;;  %v1472_v19 = vsub.f32 %v3281_v10, %v2754_v16  ;;  %v3282_v46 = vld [vmem:[#allocation19_spill] sm:$0xff]  ;;  %v1597_v20 = vmul.f32 %v1469_v11, %v1469_v11  ;;  %v3285_v29 = vld [vmem:[#allocation22_spill] sm:$0xff] }
 0x1db   : > { %v1634_v26 = vadd.f32 %v1633_v48, %v3026_v28  ;;  %v1664_v5 = vadd.f32 %v1663_v55, %v2999_v53  ;;  %v1470_v22 = vsub.f32 %v3282_v46, %v2754_v16  ;;  %v3283_v53 = vld [vmem:[#allocation20_spill] sm:$0xff]  ;;  %v1595_v59 = vmul.f32 %v1467_v41, %v1467_v41 }
 0x1dc   : > { %v1727_v45 = vadd.f32 %v1726_v63, %v3030_v49  ;;  %v1697_v58 = vadd.f32 %v1696_v52, %v3038_v9  ;;  %v1473_v3 = vsub.f32 %v3283_v53, %v2754_v16  ;;  %v3284_v9 = vld [vmem:[#allocation21_spill] sm:$0xff]  ;;  %v1600_v7 = vmul.f32 %v1472_v19, %v1472_v19 }
 0x1dd   : > { %v1665_v1 = vadd.f32 %v1664_v5, %v3032_v25  ;;  %v1635_v12 = vadd.f32 %v1634_v26, %v3040_v56  ;;  %v1471_v62 = vsub.f32 %v3284_v9, %v2754_v16  ;;  %v1598_v23 = vmul.f32 %v1470_v22, %v1470_v22  ;;  %v3293_v22 = vld [vmem:[#allocation30_spill] sm:$0xff] }
 0x1de   : > { %v1698_v28 = vadd.f32 %v1697_v58, %v3056_v35  ;;  %v1728_v49 = vadd.f32 %v1727_v45, %v3047_v18  ;;  %v1476_v35 = vsub.f32 %v2932_v33, %v2754_v16  ;;  %v1601_v24 = vmul.f32 %v1473_v3, %v1473_v3  ;;  %v3286_v33 = vld [vmem:[#allocation23_spill] sm:$0xff]  ;;  %v3291_v45 = vld [vmem:[#allocation26_spill] sm:$0xff] }
 0x1df   : > { %v1636_v27 = vadd.f32 %v1635_v12, %v3063_v61  ;;  %v1666_v25 = vadd.f32 %v1665_v1, %v3049_v8  ;;  %v1474_v61 = vsub.f32 %v2941_v40, %v2754_v16  ;;  %v1475_v15 = vsub.f32 %v3286_v33, %v2754_v16  ;;  %v3292_v58 = vld [vmem:[#allocation27_spill] sm:$0xff] }
 0x1e0   : > { %v1699_v21 = vadd.f32 %v1698_v28, %v3076_v36  ;;  %v1729_v56 = vadd.f32 %v1728_v49, %v3068_v37  ;;  %v1477_v36 = vsub.f32 %v3285_v29, %v2754_v16  ;;  %v1599_v37 = vmul.f32 %v1471_v62, %v1471_v62  ;;  %v3294_v3 = vld [vmem:[#allocation31_spill] sm:$0xff] }
 0x1e1   : > { %v1637_v17 = vadd.f32 %v1636_v27, %v3081_v14  ;;  %v1667_v18 = vadd.f32 %v1666_v25, %v3072_v2  ;;  %v1604_v2 = vmul.f32 %v1476_v35, %v1476_v35  ;;  %v1480_v40 = vsub.f32 %v3287_v34, %v2754_v16 }
 0x1e2   : > { %v1700_v47 = vadd.f32 %v1699_v21, %v1588_v51  ;;  %v1730_v8 = vadd.f32 %v1729_v56, %v3086_v54  ;;  %v1602_v48 = vmul.f32 %v1474_v61, %v1474_v61  ;;  %v3288_v54 = vld [vmem:[#allocation25_spill] sm:$0xff]  ;;  %v1605_v11 = vmul.f32 %v1477_v36, %v1477_v36 }
 0x1e3   : > { %v1638_v32 = vadd.f32 %v1637_v17, %v1586_v39  ;;  %v1668_v0 = vadd.f32 %v1667_v18, %v3092_v60  ;;  %v1478_v55 = vsub.f32 %v3288_v54, %v2754_v16  ;;  %v3289_v60 = vld [vmem:[#allocation28_spill] sm:$0xff]  ;;  %v1481_v10 = vsub.f32 %v3291_v45, %v2754_v16 }
 0x1e4   : > { %v1701_v14 = vadd.f32 %v1700_v47, %v1592_v31  ;;  %v1731_v44 = vadd.f32 %v1730_v8, %v1589_v30  ;;  %v1484_v52 = vsub.f32 %v3289_v60, %v2754_v16  ;;  %v1603_v31 = vmul.f32 %v1475_v15, %v1475_v15  ;;  %v3290_v30 = vld [vmem:[#allocation29_spill] sm:$0xff] }
 0x1e5   : > { %v1639_v51 = vadd.f32 %v1638_v32, %v1590_v38  ;;  %v1669_v57 = vadd.f32 %v1668_v0, %v1587_v50  ;;  %v1482_v26 = vsub.f32 %v3290_v30, %v2754_v16  ;;  %v1608_v50 = vmul.f32 %v1480_v40, %v1480_v40 }
 0x1e6   : > { %v1702_v4 = vadd.f32 %v1701_v14, %v1596_v6  ;;  %v1732_v39 = vadd.f32 %v1731_v44, %v1593_v43  ;;  %v1606_v43 = vmul.f32 %v1478_v55, %v1478_v55  ;;  %v1479_v1 = vsub.f32 %v3292_v58, %v2754_v16 }
 0x1e7   : > { %v1640_v63 = vadd.f32 %v1639_v51, %v1594_v13  ;;  %v1670_v41 = vadd.f32 %v1669_v57, %v1591_v42  ;;  %v1612_v42 = vmul.f32 %v1484_v52, %v1484_v52  ;;  %v1485_v12 = vsub.f32 %v3293_v22, %v2754_v16 }
 0x1e8   : > { %v1703_v5 = vadd.f32 %v1702_v4, %v1600_v7  ;;  %v1733_v38 = vadd.f32 %v1732_v39, %v1597_v20  ;;  %v1610_v20 = vmul.f32 %v1482_v26, %v1482_v26  ;;  %v1483_v49 = vsub.f32 %v3294_v3, %v2754_v16 }
 0x1e9   : > { %v1641_v19 = vadd.f32 %v1640_v63, %v1598_v23  ;;  %v1671_v6 = vadd.f32 %v1670_v41, %v1595_v59  ;;  %v1609_v9 = vmul.f32 %v1481_v10, %v1481_v10  ;;  %v1607_v7 = vmul.f32 %v1479_v1, %v1479_v1 }
 0x1ea   : > { %v1734_v46 = vadd.f32 %v1733_v38, %v1601_v24  ;;  %v1704_v13 = vadd.f32 %v1703_v5, %v1604_v2  ;;  %v1613_v35 = vmul.f32 %v1485_v12, %v1485_v12  ;;  %v1611_v18 = vmul.f32 %v1483_v49, %v1483_v49 }
 0x1eb   : > { %v1672_v28 = vadd.f32 %v1671_v6, %v1599_v37  ;;  %v1642_v53 = vadd.f32 %v1641_v19, %v1602_v48 }
 0x1ec   : > { %v1735_v27 = vadd.f32 %v1734_v46, %v1605_v11  ;;  %v1705_v59 = vadd.f32 %v1704_v13, %v1608_v50 }
 0x1ed   : > { %v1673_v62 = vadd.f32 %v1672_v28, %v1603_v31  ;;  %v1643_v25 = vadd.f32 %v1642_v53, %v1606_v43 }
 0x1ee   : > { %v1736_v21 = vadd.f32 %v1735_v27, %v1609_v9  ;;  %v1706_v56 = vadd.f32 %v1705_v59, %v1612_v42 }
 0x1ef   : > { %v1674_v23 = vadd.f32 %v1673_v62, %v1607_v7  ;;  %v1644_v17 = vadd.f32 %v1643_v25, %v1610_v20 }
 0x1f0   : > { %v1737_v61 = vadd.f32 %v1736_v21, %v1613_v35  ;;  %1752 = vst [vmem:[%s218_s11 + $0x10] sm:$0xff] %v1706_v56 }
 0x1f1   : > { %v1675_v47 = vadd.f32 %v1674_v23, %v1611_v18  ;;  %1750 = vst [vmem:[%s218_s11] sm:$0xff] %v1644_v17 }
 0x1f2   : > { %1753 = vst [vmem:[%s218_s11 + $0x18] sm:$0xff] %v1737_v61 }
 0x1f3   : > { %1751 = vst [vmem:[%s218_s11 + $0x8] sm:$0xff] %v1675_v47 }
 0x1f4   : > { %2405 = shalt.err (!%p2402_p5)
}
 0x1f5   : > { %s2406_s29 = scalar_lea.hbm %s3181_s25, 512  ;;  %s2410_s20 = scalar_lea.hbm %s3235_s3, 1024 }
 0x1f6   : > { %p2407_p9 = scmp.ne.s32.totalorder %s3181_s25, %s2406_s29  ;;  %p2411_p3 = scmp.lt.u32.totalorder %s3181_s25, %s3235_s3 }
 0x1f7   : > { %p2412_p7 = scmp.lt.u32.totalorder %s2410_s20, %s2406_s29  ;;  %p2414_p4 = scmp.lt.u32.totalorder %s2406_s29, %s3181_s25 }
 0x1f8   : > { %p2408_p1 = pnand %p2407_p9, %p2606_p10 }
 0x1f9   : > { %p2413_p13 = por %p2412_p7, %p2411_p3 }
 0x1fa   : > { %p2409_p2 = pneg %p2408_p1 }
 0x1fb   : > { %p2415_p6 = por %p2414_p4, %p2413_p13 }
 0x1fd   : > { %p2416_p8 = pnand %p2415_p6, %p2409_p2 }
 0x1ff   : > { %2419 = shalt.err (!%p2416_p8)
}
 0x200   : > { %s2485_s10 = smov 128   ;;  %s2486_s11 = smov 8  }
 0x201   : > { %2190 = dma.vmem_to_hbm [thread:$0]  (%p2606_p10), %s3183_s9, 512, %s3181_s25, %s1755_s26, %s2485_s10, %s2485_s10, %s2486_s11  }
 0x202 PF: > { %s1783_s18 = sand.u32 1, %s2458_s12   ;;  %p3295_p12 = scmp.ne.s32.totalorder %s3243_s23, 0 }
 0x203   : > { %p3296_p11 = scmp.ge.s32.totalorder %s2478_s17, 2  ;;  %s1784_s19 = scalar_lea.sflag [#allocation4], %s1783_s18 }
 0x205   : > { %p2201_p0 = pnand %p3296_p11, %p3295_p12 }
 0x207   : > { %2453 = dma.done.wait (!%p2201_p0), %s1784_s19, 512  }
 0x208   : > { %2455 = vsyncadd (!%p2201_p0), %s1784_s19, 4294966784  ;;  %s20_s17 = sadd.s32 1, %s2478_s17   ;;  %s3297_s12 = smov %s2462_s13 }
 0x209   : > { %p17_p5 = scmp.ge.s32.totalorder %s20_s17, 4   ;;  %s3298_s13 = smov %s2466_s14 }
 0x20a   : > { %s3299_s14 = smov %s2615_s5  ;;  %s3300_s15 = smov %s2474_s16 }
 0x20b   : > { %s3301_s16 = smov %s3303_s28  ;;  %19 = sbr.rel (!%p17_p5) target bundleno = 7 (0x7), region = 85 }
 0x212   :  { %1789 = vsyncpa [#allocation3], 1 }
 0x213   :  { %1791 = vsyncpa [#allocation3 + $0x1], 1 }
 0x214   :  { %1792 = vsyncpa [#allocation6], 1 }
 0x215   :  { %1793 = vsyncpa [#allocation4], 1 }
 0x216   :  { %1795 = vsyncpa [#allocation4 + $0x1], 1 }

</bundles_post_ra>
